<compile_context>
chip_gen: v5e
topology: v5e:2x2
jax: 0.10.0
libtpu: 0.0.40
codegen_flags: <defaults>
</compile_context>

<pallas_src>
import jax
import jax.numpy as jnp
from jax.experimental import pallas as pl
from jax.experimental.pallas import tpu as pltpu


LANE = 128      # lane width (last dim)
SUBLANE = 8     # sublane height (second-to-last dim)
TM_MAX = 256    # max batch-tile height (matches v6e/v7x MXU height)


def _round_up(n, m):
    return ((n + m - 1) // m) * m


# ----------------------------------------------------------------------------
# Fused kernel:  out = tanh(x@W1x + u@W1u + t*w1t + b1) @ W2 + b2
# ----------------------------------------------------------------------------
def _f_mlp_kernel(t_ref, x_ref, u_ref, w1x_ref, w1u_ref, w1t_ref, b1_ref,
                  w2_ref, b2_ref, o_ref):
    t = t_ref[0, 0]                                    # scalar from SMEM
    h = jnp.dot(x_ref[...], w1x_ref[...], preferred_element_type=jnp.float32)
    h = h + jnp.dot(u_ref[...], w1u_ref[...], preferred_element_type=jnp.float32)
    h = h + (t * w1t_ref[...] + b1_ref[...])           # bias + time row folded in
    h = jnp.tanh(h)
    o = jnp.dot(h, w2_ref[...], preferred_element_type=jnp.float32) + b2_ref[...]
    o_ref[...] = o.astype(o_ref.dtype)


# ----------------------------------------------------------------------------
# One-time parameter prep: split W1 by input block and zero-pad to 128 lanes.
# ----------------------------------------------------------------------------
def prepare_params(params, d_x, d_u):
    w1, b1, w2, b2 = params
    d_in, hidden = w1.shape
    assert d_in == d_x + d_u + 1, "W1 rows must cover [x, u, t]"
    out_dim = w2.shape[1]

    hp = _round_up(hidden, LANE)       # padded hidden width (lane-dense)
    op = _round_up(out_dim, LANE)      # padded output width (lane-dense)

    f32 = jnp.float32
    w1 = w1.astype(f32); b1 = b1.astype(f32)
    w2 = w2.astype(f32); b2 = b2.astype(f32)

    w1x = jnp.zeros((d_x, hp), f32).at[:, :hidden].set(w1[:d_x])
    w1u = jnp.zeros((d_u, hp), f32).at[:, :hidden].set(w1[d_x:d_x + d_u])
    w1t = jnp.zeros((1, hp), f32).at[:, :hidden].set(w1[d_x + d_u:])
    b1p = jnp.zeros((1, hp), f32).at[:, :hidden].set(b1)
    # Padded W2 rows are zero => padded hidden units contribute nothing.
    w2p = jnp.zeros((hp, op), f32).at[:hidden, :out_dim].set(w2)
    b2p = jnp.zeros((1, op), f32).at[:, :out_dim].set(b2)

    return {"w1x": w1x, "w1u": w1u, "w1t": w1t, "b1": b1p,
            "w2": w2p, "b2": b2p}


# ----------------------------------------------------------------------------
# Wrapper: f(t, x, u) via one pallas_call (grid over batch tiles).
# ----------------------------------------------------------------------------
def f_pallas(t, x, u, kernel_params, out_dim):
    B, d_x = x.shape
    d_u = u.shape[1]
    hp = kernel_params["w1x"].shape[1]
    op = kernel_params["w2"].shape[1]

    # Pick batch tiling: whole batch if small, else 256-row tiles.
    if B <= TM_MAX:
        b_pad = _round_up(B, SUBLANE)
        tm = b_pad
    else:
        b_pad = _round_up(B, TM_MAX)
        tm = TM_MAX

    if x.dtype != jnp.float32:
        x = x.astype(jnp.float32)
    if u.dtype != jnp.float32:
        u = u.astype(jnp.float32)
    if b_pad != B:
        x = jnp.pad(x, ((0, b_pad - B), (0, 0)))
        u = jnp.pad(u, ((0, b_pad - B), (0, 0)))

    t_arr = jnp.asarray(t, jnp.float32).reshape(1, 1)

    grid = (b_pad // tm,)
    out = pl.pallas_call(
        _f_mlp_kernel,
        out_shape=jax.ShapeDtypeStruct((b_pad, op), jnp.float32),
        grid=grid,
        in_specs=[
            # t: tiny scalar, lives in SMEM.
            pl.BlockSpec(memory_space=pltpu.MemorySpace.SMEM),
            # Activations: tiled along batch.
            pl.BlockSpec((tm, d_x), lambda i: (i, 0)),
            pl.BlockSpec((tm, d_u), lambda i: (i, 0)),
            # Weights / biases: constant block index -> stay VMEM-resident.
            pl.BlockSpec((d_x, hp), lambda i: (0, 0)),
            pl.BlockSpec((d_u, hp), lambda i: (0, 0)),
            pl.BlockSpec((1, hp), lambda i: (0, 0)),
            pl.BlockSpec((1, hp), lambda i: (0, 0)),
            pl.BlockSpec((hp, op), lambda i: (0, 0)),
            pl.BlockSpec((1, op), lambda i: (0, 0)),
        ],
        out_specs=pl.BlockSpec((tm, op), lambda i: (i, 0)),
        compiler_params=pltpu.CompilerParams(
            dimension_semantics=("parallel",)),
    )(t_arr, x, u,
      kernel_params["w1x"], kernel_params["w1u"], kernel_params["w1t"],
      kernel_params["b1"], kernel_params["w2"], kernel_params["b2"])

    # Strip batch/lane padding back to the logical result.
    return out[:B, :out_dim]


# ----------------------------------------------------------------------------
# Noise_reconstruction.forward(t, omega) == f(t, x, u) with omega = (x, u)
# ----------------------------------------------------------------------------
def noise_reconstruction_forward(t, omega, kernel_params, out_dim):
    x, u = omega
    x1 = f_pallas(t, x, u, kernel_params, out_dim)
    return x1


def init_params(key, d_x, d_u, hidden):
    d_in = d_x + d_u + 1  # [x, u, t]
    k1, k2, k3, k4 = jax.random.split(key, 4)
    w1 = jax.random.normal(k1, (d_in, hidden), jnp.float32) * (1.0 / jnp.sqrt(d_in))
    b1 = jax.random.normal(k2, (1, hidden), jnp.float32) * 0.01
    w2 = jax.random.normal(k3, (hidden, d_x), jnp.float32) * (1.0 / jnp.sqrt(hidden))
    b2 = jax.random.normal(k4, (1, d_x), jnp.float32) * 0.01
    return (w1, b1, w2, b2)


if __name__ == "__main__":
    key = jax.random.PRNGKey(0)
    k_x, k_u, k_p = jax.random.split(key, 3)

    B, D_X, D_U, HIDDEN = 8, 32, 16, 64

    x = jax.random.normal(k_x, (B, D_X), jnp.float32)
    u = jax.random.normal(k_u, (B, D_U), jnp.float32)
    t = jnp.float32(0.5)

    params = init_params(k_p, D_X, D_U, HIDDEN)
    kparams = prepare_params(params, D_X, D_U)   # split + lane-pad once

    x1 = noise_reconstruction_forward(t, (x, u), kparams, out_dim=D_X)
    x1 = jax.block_until_ready(x1)

    # Pure-JAX reference of the original (concat) formulation.
    w1, b1, w2, b2 = params
    z = jnp.concatenate([x, u, jnp.full((B, 1), t, jnp.float32)], axis=-1)
    ref = jnp.tanh(z @ w1 + b1) @ w2 + b2

    assert x1.shape == (B, D_X)
    assert jnp.allclose(x1, ref, atol=1e-4, rtol=1e-4), (
        f"max abs err {jnp.max(jnp.abs(x1 - ref))}")

    print("KERNEL_OK")
</pallas_src>

<mosaic_0001>
module attributes {stable_mosaic.version = 11 : i64} {
  func.func @_f_mlp_kernel(%arg0: i32, %arg1: memref<1x1xf32, #tpu.memory_space<smem>>, %arg2: memref<8x32xf32, #tpu.memory_space<vmem>>, %arg3: memref<8x16xf32, #tpu.memory_space<vmem>>, %arg4: memref<32x128xf32, #tpu.memory_space<vmem>>, %arg5: memref<16x128xf32, #tpu.memory_space<vmem>>, %arg6: memref<1x128xf32, #tpu.memory_space<vmem>>, %arg7: memref<1x128xf32, #tpu.memory_space<vmem>>, %arg8: memref<128x128xf32, #tpu.memory_space<vmem>>, %arg9: memref<1x128xf32, #tpu.memory_space<vmem>>, %arg10: memref<8x128xf32, #tpu.memory_space<vmem>>) attributes {dimension_semantics = [#tpu.dimension_semantics<parallel>], iteration_bounds = array<i64: 1>, scalar_prefetch = 0 : i64, scratch_operands = 0 : i64, tpu.core_type = #tpu.core_type<tc>, window_params = [{transform_indices = @transform_0, window_bounds = array<i64: 1, 1>}, {transform_indices = @transform_1, window_bounds = array<i64: 8, 32>}, {transform_indices = @transform_2, window_bounds = array<i64: 8, 16>}, {pipeline_mode = #tpu.pipeline_mode<synchronous>, transform_indices = @transform_3, window_bounds = array<i64: 32, 128>}, {pipeline_mode = #tpu.pipeline_mode<synchronous>, transform_indices = @transform_4, window_bounds = array<i64: 16, 128>}, {pipeline_mode = #tpu.pipeline_mode<synchronous>, transform_indices = @transform_5, window_bounds = array<i64: 1, 128>}, {pipeline_mode = #tpu.pipeline_mode<synchronous>, transform_indices = @transform_6, window_bounds = array<i64: 1, 128>}, {pipeline_mode = #tpu.pipeline_mode<synchronous>, transform_indices = @transform_7, window_bounds = array<i64: 128, 128>}, {pipeline_mode = #tpu.pipeline_mode<synchronous>, transform_indices = @transform_8, window_bounds = array<i64: 1, 128>}, {transform_indices = @transform_9, window_bounds = array<i64: 8, 128>}]} {
    %c0 = arith.constant 0 : index
    %c0_0 = arith.constant 0 : index
    %0 = memref.load %arg1[%c0, %c0_0] : memref<1x1xf32, #tpu.memory_space<smem>>
    %c0_1 = arith.constant 0 : index
    %c0_2 = arith.constant 0 : index
    %1 = vector.load %arg2[%c0_1, %c0_2] : memref<8x32xf32, #tpu.memory_space<vmem>>, vector<8x32xf32>
    %c0_3 = arith.constant 0 : index
    %c0_4 = arith.constant 0 : index
    %2 = vector.load %arg4[%c0_3, %c0_4] : memref<32x128xf32, #tpu.memory_space<vmem>>, vector<32x128xf32>
    %cst = arith.constant dense<0.000000e+00> : vector<8x128xf32>
    %3 = tpu.matmul %1, %2, %cst {dimension_numbers = #tpu.dot_dimension_numbers<[1], [0], [0], [1], [0, 0, 1, 1], [], []>} : vector<8x32xf32>, vector<32x128xf32>, vector<8x128xf32> -> vector<8x128xf32>
    %c0_5 = arith.constant 0 : index
    %c0_6 = arith.constant 0 : index
    %4 = vector.load %arg3[%c0_5, %c0_6] : memref<8x16xf32, #tpu.memory_space<vmem>>, vector<8x16xf32>
    %c0_7 = arith.constant 0 : index
    %c0_8 = arith.constant 0 : index
    %5 = vector.load %arg5[%c0_7, %c0_8] : memref<16x128xf32, #tpu.memory_space<vmem>>, vector<16x128xf32>
    %cst_9 = arith.constant dense<0.000000e+00> : vector<8x128xf32>
    %6 = tpu.matmul %4, %5, %cst_9 {dimension_numbers = #tpu.dot_dimension_numbers<[1], [0], [0], [1], [0, 0, 1, 1], [], []>} : vector<8x16xf32>, vector<16x128xf32>, vector<8x128xf32> -> vector<8x128xf32>
    %7 = arith.addf %3, %6 : vector<8x128xf32>
    %c0_10 = arith.constant 0 : index
    %c0_11 = arith.constant 0 : index
    %8 = vector.load %arg6[%c0_10, %c0_11] : memref<1x128xf32, #tpu.memory_space<vmem>>, vector<1x128xf32>
    %9 = vector.broadcast %0 : f32 to vector<1x128xf32>
    %10 = arith.mulf %9, %8 : vector<1x128xf32>
    %c0_12 = arith.constant 0 : index
    %c0_13 = arith.constant 0 : index
    %11 = vector.load %arg7[%c0_12, %c0_13] : memref<1x128xf32, #tpu.memory_space<vmem>>, vector<1x128xf32>
    %12 = arith.addf %10, %11 : vector<1x128xf32>
    %13 = vector.broadcast %12 : vector<1x128xf32> to vector<8x128xf32>
    %14 = arith.addf %7, %13 : vector<8x128xf32>
    %15 = math.tanh %14 : vector<8x128xf32>
    %c0_14 = arith.constant 0 : index
    %c0_15 = arith.constant 0 : index
    %16 = vector.load %arg8[%c0_14, %c0_15] : memref<128x128xf32, #tpu.memory_space<vmem>>, vector<128x128xf32>
    %cst_16 = arith.constant dense<0.000000e+00> : vector<8x128xf32>
    %17 = tpu.matmul %15, %16, %cst_16 {dimension_numbers = #tpu.dot_dimension_numbers<[1], [0], [0], [1], [0, 0, 1, 1], [], []>} : vector<8x128xf32>, vector<128x128xf32>, vector<8x128xf32> -> vector<8x128xf32>
    %c0_17 = arith.constant 0 : index
    %c0_18 = arith.constant 0 : index
    %18 = vector.load %arg9[%c0_17, %c0_18] : memref<1x128xf32, #tpu.memory_space<vmem>>, vector<1x128xf32>
    %19 = vector.broadcast %18 : vector<1x128xf32> to vector<8x128xf32>
    %20 = arith.addf %17, %19 : vector<8x128xf32>
    %c0_19 = arith.constant 0 : index
    %c0_20 = arith.constant 0 : index
    %21 = vector.load %arg10[%c0_19, %c0_20] : memref<8x128xf32, #tpu.memory_space<vmem>>, vector<8x128xf32>
    tpu.vector_store %arg10[%c0_19, %c0_20], %20 {strides = array<i32>} : memref<8x128xf32, #tpu.memory_space<vmem>>, vector<8x128xf32>,
    return
  }
  func.func @transform_0(%arg0: i32) -> (i32, i32) {
    %c0_i32 = arith.constant 0 : i32
    %c0_i32_0 = arith.constant 0 : i32
    %c0_i32_1 = arith.constant 0 : i32
    return %c0_i32, %c0_i32_0 : i32, i32
  }
  func.func @transform_1(%arg0: i32) -> (i32, i32) {
    %c0_i32 = arith.constant 0 : i32
    %c0_i32_0 = arith.constant 0 : i32
    return %arg0, %c0_i32 : i32, i32
  }
  func.func @transform_2(%arg0: i32) -> (i32, i32) {
    %c0_i32 = arith.constant 0 : i32
    %c0_i32_0 = arith.constant 0 : i32
    return %arg0, %c0_i32 : i32, i32
  }
  func.func @transform_3(%arg0: i32) -> (i32, i32) {
    %c0_i32 = arith.constant 0 : i32
    %c0_i32_0 = arith.constant 0 : i32
    %c0_i32_1 = arith.constant 0 : i32
    return %c0_i32, %c0_i32_0 : i32, i32
  }
  func.func @transform_4(%arg0: i32) -> (i32, i32) {
    %c0_i32 = arith.constant 0 : i32
    %c0_i32_0 = arith.constant 0 : i32
    %c0_i32_1 = arith.constant 0 : i32
    return %c0_i32, %c0_i32_0 : i32, i32
  }
  func.func @transform_5(%arg0: i32) -> (i32, i32) {
    %c0_i32 = arith.constant 0 : i32
    %c0_i32_0 = arith.constant 0 : i32
    %c0_i32_1 = arith.constant 0 : i32
    return %c0_i32, %c0_i32_0 : i32, i32
  }
  func.func @transform_6(%arg0: i32) -> (i32, i32) {
    %c0_i32 = arith.constant 0 : i32
    %c0_i32_0 = arith.constant 0 : i32
    %c0_i32_1 = arith.constant 0 : i32
    return %c0_i32, %c0_i32_0 : i32, i32
  }
  func.func @transform_7(%arg0: i32) -> (i32, i32) {
    %c0_i32 = arith.constant 0 : i32
    %c0_i32_0 = arith.constant 0 : i32
    %c0_i32_1 = arith.constant 0 : i32
    return %c0_i32, %c0_i32_0 : i32, i32
  }
  func.func @transform_8(%arg0: i32) -> (i32, i32) {
    %c0_i32 = arith.constant 0 : i32
    %c0_i32_0 = arith.constant 0 : i32
    %c0_i32_1 = arith.constant 0 : i32
    return %c0_i32, %c0_i32_0 : i32, i32
  }
  func.func @transform_9(%arg0: i32) -> (i32, i32) {
    %c0_i32 = arith.constant 0 : i32
    %c0_i32_0 = arith.constant 0 : i32
    return %arg0, %c0_i32 : i32, i32
  }
}

</mosaic_0001>

<bundles_post_ra>
// kernel: tpu_custom_call.1
= control target key start
LH: loop header
LB: loop body
LE: loop exit
PB: predicated region body
PF: predicated region fallthrough
CT: control target
= control target key end

     0   :  { %15 = vsyncpa [#allocation4], 0  ;;  %s488_s0 = inlined_call_operand.<no memory space> [shape: f32[1,1], index: 0, kind: input, shape index: {}]   ;;  %s489_s1 = inlined_call_operand.hbm [shape: f32[8,32], index: 1, kind: input, shape index: {}]   ;;  %s490_s2 = inlined_call_operand.hbm [shape: f32[8,16], index: 2, kind: input, shape index: {}]   ;;  %s491_s3 = inlined_call_operand.hbm [shape: f32[32,128], index: 3, kind: input, shape index: {}]   ;;  %s492_s4 = inlined_call_operand.hbm [shape: f32[16,128], index: 4, kind: input, shape index: {}]   ;;  %s493_s5 = inlined_call_operand.vmem [shape: f32[1,128], index: 5, kind: input, shape index: {}]   ;;  %s494_s6 = inlined_call_operand.vmem [shape: f32[1,128], index: 6, kind: input, shape index: {}]   ;;  %s495_s7 = inlined_call_operand.hbm [shape: f32[128,128], index: 7, kind: input, shape index: {}]   ;;  %s496_s8 = inlined_call_operand.vmem [shape: f32[1,128], index: 8, kind: input, shape index: {}]   ;;  %s497_s9 = inlined_call_operand.hbm [shape: f32[8,128], index: 9, kind: output, shape index: {}]  }
   0x1   :  { %16 = vsyncpa [#allocation7], 0 }
   0x2   :  { %17 = vsyncpa [#allocation10], 0  ;;  %s37_s11 = sshll.u32 %s490_s2, 4  ;;  %s38_s11 = int_to_ptr.hbm [resolvable:$true] %s37_s11 }
   0x3   :  { %18 = vsyncpa [#allocation5], 0  ;;  %s400_s12 = smov [#allocation6]   ;;  %s60_s16 = sshll.u32 %s492_s4, 4  ;;  %s61_s16 = int_to_ptr.hbm [resolvable:$true] %s60_s16 }
   0x4   :  { %s39_s13 = sshll.u32 %s400_s12, 4  ;;  %s401_s17 = smov [#allocation9]   ;;  %s40_s13 = int_to_ptr.vmem [resolvable:$true] %s39_s13 }
   0x5   :  { %42 = dma.hbm_to_vmem [thread:$0]  %s38_s11, 128, %s40_s13, [#allocation7]  }
   0x6   :  { %s62_s18 = sshll.u32 %s401_s17, 4  ;;  %s26_s21 = sshll.u32 %s489_s1, 4  ;;  %s63_s18 = int_to_ptr.vmem [resolvable:$true] %s62_s18  ;;  %s27_s21 = int_to_ptr.hbm [resolvable:$true] %s26_s21 }
   0x7   :  { %s402_s2 = smov 128   ;;  %s403_s22 = smov 8  }
   0x8   :  { %68 = dma.hbm_to_vmem [thread:$0]  %s61_s16, 256, %s63_s18, [#allocation10], %s402_s2, %s402_s2, %s403_s22  }
   0x9   :  { %s47_s25 = sshll.u32 %s491_s3, 4  ;;  %s404_s26 = smov [#allocation3]   ;;  %s48_s25 = int_to_ptr.hbm [resolvable:$true] %s47_s25 }
   0xa   :  { %s28_s27 = sshll.u32 %s404_s26, 4  ;;  %s405_s4 = smov [#allocation8]   ;;  %s29_s27 = int_to_ptr.vmem [resolvable:$true] %s28_s27 }
   0xb   :  { %31 = dma.hbm_to_vmem [thread:$0]  %s27_s21, 128, %s29_s27, [#allocation4]  }
   0xc   :  { %s49_s28 = sshll.u32 %s405_s4, 4  ;;  %s77_s1 = sshll.u32 %s495_s7, 4  ;;  %s50_s28 = int_to_ptr.vmem [resolvable:$true] %s49_s28  ;;  %s78_s1 = int_to_ptr.hbm [resolvable:$true] %s77_s1 }
   0xd   :  { %55 = dma.hbm_to_vmem [thread:$0]  %s48_s25, 512, %s50_s28, [#allocation7], %s402_s2, %s402_s2, %s403_s22  }
   0xe   :  { %s406_s10 = smov [#allocation11]  }
   0xf   :  { %s79_s11 = sshll.u32 %s406_s10, 4  ;;  %s80_s11 = int_to_ptr.vmem [resolvable:$true] %s79_s11 }
  0x10   :  { %85 = dma.hbm_to_vmem [thread:$0]  %s78_s1, 2048, %s80_s11, [#allocation10], %s402_s2, %s402_s2, %s403_s22  }
  0x11   :  { %392 = dma.done.wait [#allocation4], 128  }
  0x12   :  { %393 = vsyncadd [#allocation4], 4294967168 }
  0x13   :  { %394 = dma.done.wait [#allocation7], 640  }
  0x14   :  { %395 = vsyncadd [#allocation7], 4294966656 }
  0x15   :  { %396 = dma.done.wait [#allocation10], 2304  }
  0x16   :  { %397 = vsyncadd [#allocation10], 4294964992  ;;  %v113_v0 = vld [vmem:[#allocation8 + $0x18] sm:$0xff]  ;;  %v112_v1 = vld [vmem:[#allocation8 + $0x10] sm:$0xff]  ;;  %vm117_vm0 = vcmask 130048   ;;  %vm141_vm1 = vcmask 261120   ;;  %v166_v25 = vstv %s488_s0 }
  0x17   :  { %v116_v2 = vld [vmem:[#allocation9 + $0x8] sm:$0xff]  ;;  %157 = vmatpush.msra.mxu1 %v113_v0  ;;  %v115_v3 = vld [vmem:[#allocation9] sm:$0xff]  ;;  %v114_v5 = vld [vmem:[#allocation6] sm:$0xff]  ;;  %s407_s17 = smov [#allocation12]   ;;  %s223_s20 = sshll.u32 %s497_s9, 4  ;;  %s224_s20 = int_to_ptr.hbm [resolvable:$true] %s223_s20 }
  0x18   :  { %135 = vmatpush.msra.mxu0 %v116_v2  ;;  %v111_v4 = vld [vmem:[#allocation8 + $0x8] sm:$0xff]  ;;  %v189_v7 = vld [vmem:[#allocation11 + $0x70] sm:$0xff]  ;;  %v109_v9 = vld [vmem:[#allocation3] sm:$0xff]  ;;  %s221_s0 = sshll.u32 %s407_s17, 4  ;;  %s222_s0 = int_to_ptr.vmem [resolvable:$true] %s221_s0 }
  0x19   :  { %v190_v6 = vld [vmem:[#allocation11 + $0x78] sm:$0xff]  ;;  %158 = vmatpush.msra.mxu1 %v112_v1  ;;  %v110_v8 = vld [vmem:[#allocation8] sm:$0xff]  ;;  %v188_v10 = vld [vmem:[#allocation11 + $0x68] sm:$0xff] }
  0x1a   :  { %136 = vmatpush.msra.mxu0 %v115_v3  ;;  %195 = vmatpush.msra.mxu2 %v190_v6  ;;  %v187_v11 = vld [vmem:[#allocation11 + $0x60] sm:$0xff]  ;;  %v186_v12 = vld [vmem:[#allocation11 + $0x58] sm:$0xff]  ;;  %v185_v13 = vld [vmem:[#allocation11 + $0x50] sm:$0xff] }
  0x1b   :  { %235 = vmatmul.msk.f32.vlgmr.msra.gmra.mxu0 %vm117_vm0, %v114_v5  ;;  %159 = vmatpush.msra.mxu1 %v111_v4  ;;  %v184_v14 = vld [vmem:[#allocation11 + $0x48] sm:$0xff]  ;;  %v183_v15 = vld [vmem:[#allocation11 + $0x40] sm:$0xff]  ;;  %v182_v16 = vld [vmem:[#allocation11 + $0x38] sm:$0xff] }
  0x1c   :  { %196 = vmatpush.msra.mxu2 %v189_v7  ;;  %v181_v17 = vld [vmem:[#allocation11 + $0x30] sm:$0xff]  ;;  %v180_v18 = vld [vmem:[#allocation11 + $0x28] sm:$0xff]  ;;  %v179_v19 = vld [vmem:[#allocation11 + $0x20] sm:$0xff] }
  0x1d   :  { %160 = vmatpush.msra.mxu1 %v110_v8  ;;  %v178_v20 = vld [vmem:[#allocation11 + $0x18] sm:$0xff]  ;;  %v177_v21 = vld [vmem:[#allocation11 + $0x10] sm:$0xff]  ;;  %v176_v22 = vld [vmem:[#allocation11 + $0x8] sm:$0xff] }
  0x1e   :  { %236 = vmatmul.msk.f32.vlgmr.msra.gmra.mxu1 %vm141_vm1, %v109_v9  ;;  %197 = vmatpush.msra.mxu2 %v188_v10  ;;  %v175_v23 = vld [vmem:[#allocation11] sm:$0xff] }
  0x1f   :  { %v165_v24 = vld [vmem:[%s493_s5] sm:$0x1] }
  0x20   :  { %198 = vmatpush.msra.mxu2 %v187_v11  ;;  %v167_v26 = vmul.f32 %v166_v25, %v165_v24  ;;  %v168_v27 = vld [vmem:[%s494_s6] sm:$0x1] }
  0x21   :  { %v245_v35 = vld [vmem:[%s496_s8] ss:$0 sm:$0xff] }
  0x22   :  { %199 = vmatpush.msra.mxu2 %v186_v12  ;;  %v169_v28 = vadd.f32 %v168_v27, %v167_v26 }
  0x24   :  { %200 = vmatpush.msra.mxu2 %v185_v13  ;;  %v171_v30 = vperm.slane %v169_v28, 0 }
  0x26   :  { %201 = vmatpush.msra.mxu2 %v184_v14 }
  0x28   :  { %202 = vmatpush.msra.mxu2 %v183_v15 }
  0x2a   :  { %203 = vmatpush.msra.mxu2 %v182_v16 }
  0x2c   :  { %204 = vmatpush.msra.mxu2 %v181_v17 }
  0x2e   :  { %205 = vmatpush.msra.mxu2 %v180_v18 }
  0x30   :  { %206 = vmatpush.msra.mxu2 %v179_v19 }
  0x32   :  { %207 = vmatpush.msra.mxu2 %v178_v20 }
  0x34   :  { %208 = vmatpush.msra.mxu2 %v177_v21 }
  0x36   :  { %209 = vmatpush.msra.mxu2 %v176_v22 }
  0x38   :  { %210 = vmatpush.msra.mxu2 %v175_v23 }
  0x98   :  { %v138_v29 = vpop.f32.mrf.mxu0 }
  0x9b   :  { %v162_v31 = vpop.f32.mrf.mxu1 }
  0x9c   :  { %v163_v32 = vadd.f32 %v162_v31, %v138_v29 }
  0x9e   :  { %v173_v33 = vadd.f32 %v171_v30, %v163_v32 }
  0xa0   :  { %246 = vtanh.f32 %v173_v33 }
  0xa6   :  { %v247_v34 = vpop.eup %246 }
  0xa7   :  { %211 = vmatmul.f32.vlgmr.msra.gmra.mxu2 %v247_v34 }
 0x12a   :  { %v212_v36 = vpop.f32.mrf.mxu2 }
 0x12b   :  { %v213_v37 = vadd.f32 %v245_v35, %v212_v36 }
 0x12d   :  { %215 = vst [vmem:[#allocation12] sm:$0xff] %v213_v37 }
 0x12e   :  { %226 = dma.vmem_to_hbm [thread:$0]  %s222_s0, 128, %s224_s20, [#allocation5]  }
 0x12f   :  { %398 = dma.done.wait [#allocation5], 128  }
 0x130   :  { %399 = vsyncadd [#allocation5], 4294967168 }
 0x131   :  { %231 = vsyncpa [#allocation4], 1 }
 0x132   :  { %232 = vsyncpa [#allocation7], 1 }
 0x133   :  { %233 = vsyncpa [#allocation10], 1 }
 0x134   :  { %234 = vsyncpa [#allocation5], 1 }

</bundles_post_ra>
